<compile_context>
chip_gen: v5e
topology: v5e:2x2
jax: 0.10.0
libtpu: 0.0.40
codegen_flags: <defaults>
</compile_context>

<pallas_src>
import functools

import jax
import jax.numpy as jnp
from jax.experimental import pallas as pl
from jax.experimental.pallas import tpu as pltpu

IGNORE_INDEX = -100
_VMEM_LIMIT = 32 << 20          # scoped VMEM request; safe on v5e/v6e/v7x
_TILE_BUDGET = 12 << 20         # accounted bytes for tiles + in-kernel working set


def _cdiv(a, b):
    return -(-a // b)


# ---------------------------------------------------------------------------
# Kernel B: NCHW-native. Block is (1, C, TS): classes on sublanes, flattened
# spatial on lanes. Reduction over axis 0.
# ---------------------------------------------------------------------------
def _ce_nchw_kernel(x_ref, t_ref, sum_ref, cnt_ref, *, ignore_index):
    x = x_ref[0].astype(jnp.float32)                        # (C, TS) f32
    t = t_ref[0]                                            # (1, TS) i32

    cls = jax.lax.broadcasted_iota(jnp.int32, x.shape, 0)   # class id per sublane
    m = jnp.max(x, axis=0, keepdims=True)                   # (1, TS)
    ex = jnp.exp(x - m)
    lse = m + jnp.log(jnp.sum(ex, axis=0, keepdims=True))   # (1, TS)

    # gather logit at the target class via a sublane compare + masked sum
    logit_t = jnp.sum(jnp.where(cls == t, x, 0.0), axis=0, keepdims=True)
    valid = (t != ignore_index).astype(jnp.float32)         # (1, TS)
    loss = valid * (lse - logit_t)                          # -log_softmax[target]

    # lane-dense per-tile partial sums (final reduction done in the wrapper)
    sum_ref[...] = jnp.broadcast_to(jnp.sum(loss), sum_ref.shape)
    cnt_ref[...] = jnp.broadcast_to(jnp.sum(valid), cnt_ref.shape)


# ---------------------------------------------------------------------------
# Kernel A: classes-last (2-D inputs). Block is (TR, C): rows on sublanes,
# classes on lanes (class axis is already last in HBM, so no transpose/pad).
# ---------------------------------------------------------------------------
def _ce_rows_kernel(x_ref, t_ref, sum_ref, cnt_ref, *, ignore_index):
    x = x_ref[...].astype(jnp.float32)                      # (TR, C) f32
    t = t_ref[...]                                          # (TR, 1) i32

    cls = jax.lax.broadcasted_iota(jnp.int32, x.shape, 1)   # class id per lane
    m = jnp.max(x, axis=1, keepdims=True)                   # (TR, 1)
    ex = jnp.exp(x - m)
    lse = m + jnp.log(jnp.sum(ex, axis=1, keepdims=True))   # (TR, 1)

    logit_t = jnp.sum(jnp.where(cls == t, x, 0.0), axis=1, keepdims=True)
    valid = (t != ignore_index).astype(jnp.float32)         # (TR, 1)
    loss = valid * (lse - logit_t)

    sum_ref[...] = jnp.broadcast_to(jnp.sum(loss), sum_ref.shape)
    cnt_ref[...] = jnp.broadcast_to(jnp.sum(valid), cnt_ref.shape)


# ---------------------------------------------------------------------------
# Tile-size selection from a VMEM budget (double-buffered inputs + f32 working
# copies), balanced so padding waste stays bounded.
# ---------------------------------------------------------------------------
def _pick_tile_cols(S, C, dtype, budget_bytes=_TILE_BUDGET):
    itemsize = jnp.dtype(dtype).itemsize
    pack = 8 * max(1, 4 // itemsize)                 # sublane packing (8/16/32)
    in_col = _cdiv(C, pack) * pack * itemsize        # native-dtype x bytes / column
    f32_col = _cdiv(C, 8) * 8 * 4                    # f32 working copies / column
    per_col = 2 * in_col + 2 * 32 + 6 * f32_col      # dbl-buf x + targets + headroom
    max_cols = max(128, min(budget_bytes // per_col, 1 << 16))
    n_tiles = _cdiv(S, max_cols)
    return _cdiv(_cdiv(S, n_tiles), 128) * 128


def _pick_tile_rows(rows, C, dtype, budget_bytes=_TILE_BUDGET):
    itemsize = jnp.dtype(dtype).itemsize
    in_row = _cdiv(C, 128) * 128 * itemsize          # native-dtype x bytes / row
    f32_row = _cdiv(C, 128) * 128 * 4                # f32 working copies / row
    per_row = 2 * in_row + 2 * 512 + 6 * f32_row     # dbl-buf x + lane-padded targets
    max_rows = max(8, min(budget_bytes // per_row, 1 << 14))
    n_tiles = _cdiv(rows, max_rows)
    return _cdiv(_cdiv(rows, n_tiles), 8) * 8


# ---------------------------------------------------------------------------
# Wrappers
# ---------------------------------------------------------------------------
def _ce_nchw(x, target, ignore_index):
    N, C = x.shape[0], x.shape[1]
    S = 1
    for d in x.shape[2:]:
        S *= int(d)
    x3 = x.reshape(N, C, S)                          # free reshape, native dtype
    t3 = target.reshape(N, 1, S).astype(jnp.int32)

    tile_s = _pick_tile_cols(S, C, x.dtype)
    s_tiles = _cdiv(S, tile_s)
    s_pad = s_tiles * tile_s
    if s_pad != S:
        x3 = jnp.pad(x3, ((0, 0), (0, 0), (0, s_pad - S)))
        t3 = jnp.pad(t3, ((0, 0), (0, 0), (0, s_pad - S)),
                     constant_values=ignore_index)

    kernel = functools.partial(_ce_nchw_kernel, ignore_index=ignore_index)
    psum, pcnt = pl.pallas_call(
        kernel,
        out_shape=(jax.ShapeDtypeStruct((N, s_tiles, 128), jnp.float32),
                   jax.ShapeDtypeStruct((N, s_tiles, 128), jnp.float32)),
        grid_spec=pltpu.PrefetchScalarGridSpec(
            num_scalar_prefetch=0,
            grid=(N, s_tiles),
            in_specs=[
                pl.BlockSpec((1, C, tile_s), lambda b, s: (b, 0, s)),
                pl.BlockSpec((1, 1, tile_s), lambda b, s: (b, 0, s)),
            ],
            out_specs=[
                pl.BlockSpec((1, 1, 128), lambda b, s: (b, s, 0)),
                pl.BlockSpec((1, 1, 128), lambda b, s: (b, s, 0)),
            ],
        ),
        compiler_params=pltpu.CompilerParams(
            dimension_semantics=("parallel", "parallel"),
            vmem_limit_bytes=_VMEM_LIMIT),
    )(x3, t3)
    return jnp.sum(psum[:, :, 0]), jnp.sum(pcnt[:, :, 0])


def _ce_rows(x, target, ignore_index):
    rows, C = x.shape
    t2 = target.reshape(rows, 1).astype(jnp.int32)

    tile_r = _pick_tile_rows(rows, C, x.dtype)
    n_tiles = _cdiv(rows, tile_r)
    r_pad = n_tiles * tile_r
    x2 = x
    if r_pad != rows:
        x2 = jnp.pad(x2, ((0, r_pad - rows), (0, 0)))
        t2 = jnp.pad(t2, ((0, r_pad - rows), (0, 0)),
                     constant_values=ignore_index)

    kernel = functools.partial(_ce_rows_kernel, ignore_index=ignore_index)
    psum, pcnt = pl.pallas_call(
        kernel,
        out_shape=(jax.ShapeDtypeStruct((n_tiles, 128), jnp.float32),
                   jax.ShapeDtypeStruct((n_tiles, 128), jnp.float32)),
        grid_spec=pltpu.PrefetchScalarGridSpec(
            num_scalar_prefetch=0,
            grid=(n_tiles,),
            in_specs=[
                pl.BlockSpec((tile_r, C), lambda i: (i, 0)),
                pl.BlockSpec((tile_r, 1), lambda i: (i, 0)),
            ],
            out_specs=[
                pl.BlockSpec((1, 128), lambda i: (i, 0)),
                pl.BlockSpec((1, 128), lambda i: (i, 0)),
            ],
        ),
        compiler_params=pltpu.CompilerParams(
            dimension_semantics=("parallel",),
            vmem_limit_bytes=_VMEM_LIMIT),
    )(x2, t2)
    return jnp.sum(psum[:, 0]), jnp.sum(pcnt[:, 0])


def cross_entropy(x, target, weight=None, ignore_index=IGNORE_INDEX,
                  reduction='mean'):
    """Equivalent of F.nll_loss(F.log_softmax(x, 1), target, ...).

    x:      (N, C) or (N, C, *spatial) logits (any float dtype; upcast in-kernel)
    target: (N,)   or (N, *spatial)    int class indices (or ignore_index)
    """
    # TODO(synk): per-class `weight` tensor and reduction='none' not implemented
    #             (module defaults are weight=None, reduction='mean').
    assert weight is None
    assert reduction in ('mean', 'sum')

    if x.ndim == 2:
        loss_sum, cnt = _ce_rows(x, target, ignore_index)
    else:
        loss_sum, cnt = _ce_nchw(x, target, ignore_index)

    if reduction == 'mean':
        return loss_sum / cnt        # NaN if every element is ignored (matches torch)
    return loss_sum


# ---------------------------------------------------------------------------
# Pure-JAX reference
# ---------------------------------------------------------------------------
def _reference(x, target, ignore_index=IGNORE_INDEX):
    C = x.shape[1]
    x2 = jnp.moveaxis(x, 1, -1).reshape(-1, C).astype(jnp.float32)
    t2 = target.reshape(-1).astype(jnp.int32)
    logp = jax.nn.log_softmax(x2, axis=-1)
    valid = t2 != ignore_index
    safe_t = jnp.where(valid, t2, 0)
    nll = -jnp.take_along_axis(logp, safe_t[:, None], axis=-1)[:, 0]
    nll = jnp.where(valid, nll, 0.0)
    return jnp.sum(nll) / jnp.sum(valid.astype(jnp.float32))


if __name__ == "__main__":
    key = jax.random.PRNGKey(0)
    kx, kt, ki, kx2, kt2 = jax.random.split(key, 5)

    # 4-D NCHW segmentation-style case (NCHW-native path: no transpose, no class pad).
    N, C, H, W = 2, 4, 16, 16
    x = jax.random.normal(kx, (N, C, H, W), dtype=jnp.float32)
    target = jax.random.randint(kt, (N, H, W), 0, C, dtype=jnp.int32)
    drop = jax.random.bernoulli(ki, 0.1, (N, H, W))
    target = jnp.where(drop, IGNORE_INDEX, target)

    loss = jax.block_until_ready(cross_entropy(x, target))
    ref = _reference(x, target)
    assert jnp.allclose(loss, ref, rtol=1e-5, atol=1e-5), (loss, ref)

    # 2-D (N, C) classification case (classes-on-lanes path, odd row count).
    N2, C2 = 37, 10
    x2 = jax.random.normal(kx2, (N2, C2), dtype=jnp.float32)
    t2 = jax.random.randint(kt2, (N2,), 0, C2, dtype=jnp.int32)
    t2 = t2.at[::7].set(IGNORE_INDEX)
    loss2 = jax.block_until_ready(cross_entropy(x2, t2))
    ref2 = _reference(x2, t2)
    assert jnp.allclose(loss2, ref2, rtol=1e-5, atol=1e-5), (loss2, ref2)

    print("KERNEL_OK")
</pallas_src>

<mosaic_0001>
module attributes {stable_mosaic.version = 11 : i64} {
  func.func @_ce_nchw_kernel(%arg0: i32, %arg1: i32, %arg2: memref<1x4x256xf32, #tpu.memory_space<vmem>>, %arg3: memref<1x1x256xi32, #tpu.memory_space<vmem>>, %arg4: memref<1x1x128xf32, #tpu.memory_space<vmem>>, %arg5: memref<1x1x128xf32, #tpu.memory_space<vmem>>) attributes {dimension_semantics = [#tpu.dimension_semantics<parallel>, #tpu.dimension_semantics<parallel>], iteration_bounds = array<i64: 2, 1>, scalar_prefetch = 0 : i64, scratch_operands = 0 : i64, tpu.core_type = #tpu.core_type<tc>, window_params = [{transform_indices = @transform_0, window_bounds = array<i64: 1, 4, 256>}, {transform_indices = @transform_1, window_bounds = array<i64: 1, 1, 256>}, {transform_indices = @transform_2, window_bounds = array<i64: 1, 1, 128>}, {transform_indices = @transform_3, window_bounds = array<i64: 1, 1, 128>}]} {
    %c0 = arith.constant 0 : index
    %c0_0 = arith.constant 0 : index
    %c0_1 = arith.constant 0 : index
    %0 = vector.load %arg2[%c0, %c0_0, %c0_1] : memref<1x4x256xf32, #tpu.memory_space<vmem>>, vector<1x4x256xf32>
    %1 = vector.shape_cast %0 : vector<1x4x256xf32> to vector<4x256xf32>
    %c0_2 = arith.constant 0 : index
    %c0_3 = arith.constant 0 : index
    %c0_4 = arith.constant 0 : index
    %2 = vector.load %arg3[%c0_2, %c0_3, %c0_4] : memref<1x1x256xi32, #tpu.memory_space<vmem>>, vector<1x1x256xi32>
    %3 = vector.shape_cast %2 : vector<1x1x256xi32> to vector<1x256xi32>
    %4 = tpu.iota {dimensions = array<i32: 0>} : vector<4x256xi32>
    %cst = arith.constant dense<0xFF800000> : vector<256xf32>
    %5 = vector.multi_reduction <maximumf>, %1, %cst [0] : vector<4x256xf32> to vector<256xf32>
    %6 = vector.shape_cast %5 : vector<256xf32> to vector<1x256xf32>
    %7 = vector.broadcast %6 : vector<1x256xf32> to vector<4x256xf32>
    %8 = arith.subf %1, %7 : vector<4x256xf32>
    %9 = math.exp %8 : vector<4x256xf32>
    %cst_5 = arith.constant dense<0.000000e+00> : vector<256xf32>
    %10 = vector.multi_reduction <add>, %9, %cst_5 [0] : vector<4x256xf32> to vector<256xf32>
    %11 = vector.shape_cast %10 : vector<256xf32> to vector<1x256xf32>
    %12 = math.log %11 : vector<1x256xf32>
    %13 = arith.addf %6, %12 : vector<1x256xf32>
    %14 = vector.broadcast %3 : vector<1x256xi32> to vector<4x256xi32>
    %15 = arith.cmpi eq, %4, %14 : vector<4x256xi32>
    %cst_6 = arith.constant 0.000000e+00 : f32
    %16 = vector.broadcast %cst_6 : f32 to vector<4x256xf32>
    %17 = arith.select %15, %1, %16 : vector<4x256xi1>, vector<4x256xf32>
    %cst_7 = arith.constant dense<0.000000e+00> : vector<256xf32>
    %18 = vector.multi_reduction <add>, %17, %cst_7 [0] : vector<4x256xf32> to vector<256xf32>
    %19 = vector.shape_cast %18 : vector<256xf32> to vector<1x256xf32>
    %c-100_i32 = arith.constant -100 : i32
    %20 = vector.broadcast %c-100_i32 : i32 to vector<1x256xi32>
    %21 = arith.cmpi ne, %3, %20 : vector<1x256xi32>
    %22 = arith.extui %21 : vector<1x256xi1> to vector<1x256xi32>
    %23 = arith.sitofp %22 : vector<1x256xi32> to vector<1x256xf32>
    %24 = arith.subf %13, %19 : vector<1x256xf32>
    %25 = arith.mulf %23, %24 : vector<1x256xf32>
    %26 = vector.shape_cast %25 : vector<1x256xf32> to vector<1x1x256xf32>
    %cst_8 = arith.constant dense<0.000000e+00> : vector<1xf32>
    %27 = vector.multi_reduction <add>, %26, %cst_8 [1, 2] : vector<1x1x256xf32> to vector<1xf32>
    %28 = vector.shape_cast %27 : vector<1xf32> to vector<1x1x1xf32>
    %29 = vector.extract %28[0, 0, 0] : f32 from vector<1x1x1xf32>
    %30 = vector.broadcast %29 : f32 to vector<1x1x128xf32>
    %c0_9 = arith.constant 0 : index
    %c0_10 = arith.constant 0 : index
    %c0_11 = arith.constant 0 : index
    %31 = vector.load %arg4[%c0_9, %c0_10, %c0_11] : memref<1x1x128xf32, #tpu.memory_space<vmem>>, vector<1x1x128xf32>
    tpu.vector_store %arg4[%c0_9, %c0_10, %c0_11], %30 {strides = array<i32>} : memref<1x1x128xf32, #tpu.memory_space<vmem>>, vector<1x1x128xf32>,
    %32 = vector.shape_cast %23 : vector<1x256xf32> to vector<1x1x256xf32>
    %cst_12 = arith.constant dense<0.000000e+00> : vector<1xf32>
    %33 = vector.multi_reduction <add>, %32, %cst_12 [1, 2] : vector<1x1x256xf32> to vector<1xf32>
    %34 = vector.shape_cast %33 : vector<1xf32> to vector<1x1x1xf32>
    %35 = vector.extract %34[0, 0, 0] : f32 from vector<1x1x1xf32>
    %36 = vector.broadcast %35 : f32 to vector<1x1x128xf32>
    %c0_13 = arith.constant 0 : index
    %c0_14 = arith.constant 0 : index
    %c0_15 = arith.constant 0 : index
    %37 = vector.load %arg5[%c0_13, %c0_14, %c0_15] : memref<1x1x128xf32, #tpu.memory_space<vmem>>, vector<1x1x128xf32>
    tpu.vector_store %arg5[%c0_13, %c0_14, %c0_15], %36 {strides = array<i32>} : memref<1x1x128xf32, #tpu.memory_space<vmem>>, vector<1x1x128xf32>,
    return
  }
  func.func @transform_0(%arg0: i32, %arg1: i32) -> (i32, i32, i32) {
    %c0_i32 = arith.constant 0 : i32
    %c0_i32_0 = arith.constant 0 : i32
    return %arg0, %c0_i32, %arg1 : i32, i32, i32
  }
  func.func @transform_1(%arg0: i32, %arg1: i32) -> (i32, i32, i32) {
    %c0_i32 = arith.constant 0 : i32
    %c0_i32_0 = arith.constant 0 : i32
    return %arg0, %c0_i32, %arg1 : i32, i32, i32
  }
  func.func @transform_2(%arg0: i32, %arg1: i32) -> (i32, i32, i32) {
    %c0_i32 = arith.constant 0 : i32
    %c0_i32_0 = arith.constant 0 : i32
    return %arg0, %arg1, %c0_i32 : i32, i32, i32
  }
  func.func @transform_3(%arg0: i32, %arg1: i32) -> (i32, i32, i32) {
    %c0_i32 = arith.constant 0 : i32
    %c0_i32_0 = arith.constant 0 : i32
    return %arg0, %arg1, %c0_i32 : i32, i32, i32
  }
}

</mosaic_0001>

<bundles_post_ra>
// kernel: tpu_custom_call.1
= control target key start
LH: loop header
LB: loop body
LE: loop exit
PB: predicated region body
PF: predicated region fallthrough
CT: control target
= control target key end

     0   :  { %9 = vsyncpa [#allocation3], 0  ;;  %s1023_s0 = inlined_call_operand.hbm [shape: f32[2,4,256], index: 0, kind: input, shape index: {}]   ;;  %s1024_s1 = inlined_call_operand.hbm [shape: s32[2,1,256], index: 1, kind: input, shape index: {}]   ;;  %s1025_s2 = inlined_call_operand.hbm [shape: f32[2,1,128], index: 2, kind: output, shape index: {0}]   ;;  %s1026_s3 = inlined_call_operand.hbm [shape: f32[2,1,128], index: 3, kind: output, shape index: {1}]  }
   0x1   :  { %11 = vsyncpa [#allocation3 + $0x1], 0 }
   0x2   :  { %12 = vsyncpa [#allocation6], 0 }
   0x3   :  { %14 = vsyncpa [#allocation6 + $0x1], 0 }
   0x4   :  { %15 = vsyncpa [#allocation4], 0 }
   0x5   :  { %17 = vsyncpa [#allocation4 + $0x1], 0 }
   0x6   :  { %18 = vsyncpa [#allocation9], 0 }
   0x7   :  { %20 = vsyncpa [#allocation9 + $0x1], 0  ;;  %s861_s12 = smov 0   ;;  %s863_s13 = smov 0  }
   0x8   :  { %s865_s14 = smov 0   ;;  %s867_s15 = smov 0  }
   0x9   :  { %s869_s16 = smov 0   ;;  %s871_s17 = smov 0  }
   0xa LB: > { %s561_s18 = sadd.s32 4294967295, %s838_s17   ;;  %s562_s19 = sadd.s32 4294967294, %s838_s17   ;;  %s838_s17 = sphi %s871_s17, %s26_s17   ;;  %s834_s16 = sphi %s869_s16, %s1036_s16   ;;  %s830_s15 = sphi %s867_s15, %s1035_s15   ;;  %s826_s14 = sphi %s865_s14, %s1034_s14   ;;  %s822_s13 = sphi %s863_s13, %s1033_s13   ;;  %s818_s12 = sphi %s861_s12, %s1032_s12  }
   0xb   : > { %s38_s20 = sadd.s32 1, %s834_s16  ;;  %s47_s21 = sadd.s32 1, %s826_s14 }
   0xc   : > { %p40_p0 = scmp.ge.s32.totalorder %s38_s20, 2  ;;  %p54_p1 = scmp.ne.s32.totalorder %s826_s14, %s822_s13 }
   0xd   : > { %p55_p2 = scmp.eq.s32.totalorder %s838_s17, 0  ;;  %p60_p3 = scmp.ne.s32.totalorder %s822_s13, %s818_s12 }
   0xe   : > { %s1038_s20 = smov (%p40_p0, %s38_s20), 0  ;;  %p61_p5 = scmp.eq.s32.totalorder %s561_s18, 0 }
   0xf   : > { %p902_p4 = por %p55_p2, %p54_p1  ;;  %s42_s23 = ssub.s32 %s834_s16, %s1038_s20 }
  0x10   : > { %p114_p6 = scmp.eq.s32.totalorder %s561_s18, 1  ;;  %p45_p7 = scmp.eq.s32.totalorder %s42_s23, 0 }
  0x11   : > { %p908_p8 = por %p61_p5, %p60_p3  ;;  %p120_p10 = scmp.eq.s32.totalorder %s562_s19, 1 }
  0x12   : > { %p912_p9 = por %p114_p6, %p54_p1  ;;  %p564_p12 = scmp.ge.s32.totalorder %s838_s17, 2 }
  0x13   : > { %s917_s26 = scalar_select %p45_p7, %s826_s14, %s47_s21  }
  0x14   : > { %p919_p11 = por %p120_p10, %p60_p3  ;;  %p603_p13 = scmp.lt.s32.totalorder %s838_s17, 2 }
  0x15   : > { %s168_s28 = sand.u32 1, %s826_s14   ;;  %s576_s30 = sshll.u32 %s834_s16, 3 }
  0x16   : > { %s565_s29 = sshll.u32 %s168_s28, 3  ;;  %s179_s6 = scalar_lea.hbm %s1023_s0, %s576_s30 }
  0x17   : > { %s172_s7 = scalar_lea.vmem [#allocation2], %s565_s29  ;;  %s181_s9 = sshll.u32 %s179_s6, 4  ;;  %s182_s9 = int_to_ptr.hbm [resolvable:$true] %s181_s9 }
  0x18   : > { %s183_s8 = sshll.u32 %s172_s7, 4  ;;  %p932_p0 = pnand %p603_p13, %p902_p4  ;;  %s184_s8 = int_to_ptr.vmem [resolvable:$true] %s183_s8 }
  0x19   : > { %p570_p1 = scmp.ge.s32.totalorder %s838_s17, 1  ;;  %p209_p2 = scmp.lt.s32.totalorder %s838_s17, 3 }
  0x1a   : > { %s169_s11 = scalar_lea.sflag [#allocation3], %s168_s28  ;;  %s568_s18 = sshll.u32 %s168_s28, 1 }
  0x1b   : > { %592 = dma.hbm_to_vmem [thread:$0]  (!%p932_p0), %s182_s9, 128, %s184_s8, %s169_s11  }
  0x1c   : > { %p210_p3 = pnand %p570_p1, %p209_p2  ;;  %s569_s19 = sshll.u32 %s834_s16, 1 }
  0x1d   : > { %s200_s29 = scalar_lea.hbm %s1024_s1, %s569_s19  ;;  %s194_s30 = scalar_lea.vmem [#allocation5], %s568_s18 }
  0x1e   : > { %s204_s22 = sshll.u32 %s194_s30, 4  ;;  %s202_s4 = sshll.u32 %s200_s29, 4  ;;  %s205_s22 = int_to_ptr.vmem [resolvable:$true] %s204_s22  ;;  %s203_s4 = int_to_ptr.hbm [resolvable:$true] %s202_s4 }
  0x1f   : > { %s191_s5 = scalar_lea.sflag [#allocation6], %s168_s28  ;;  %213 = sbr.rel (%p210_p3) target bundleno = 317 (0x13d), region = 28 }
  0x20   : > { %595 = dma.hbm_to_vmem [thread:$0]  (!%p932_p0), %s203_s4, 32, %s205_s22, %s191_s5  }
  0x21   : > { %s947_s6 = sand.u32 (!%p210_p3), 1, %s822_s13  }
  0x22   : > { %s571_s7 = sshll.u32 (!%p210_p3), %s947_s6, 3  ;;  %s216_s8 = scalar_lea.sflag (!%p210_p3), [#allocation3], %s947_s6 }
  0x23   : > { %s219_s9 = scalar_lea.vmem (!%p210_p3), [#allocation2], %s571_s7 }
  0x24   : > { %801 = dma.done.wait (%p908_p8), %s216_s8, 128  }
  0x25   : > { %803 = vsyncadd (%p908_p8), %s216_s8, 4294967168  ;;  %s572_s28 = sshll.u32 %s947_s6, 1  ;;  %s226_s10 = scalar_lea.sflag [#allocation6], %s947_s6 }
  0x26   : > { %s229_s11 = scalar_lea.vmem [#allocation5], %s572_s28 }
  0x27   : > { %805 = dma.done.wait (%p908_p8), %s226_s10, 32  }
  0x28   : > { %807 = vsyncadd (%p908_p8), %s226_s10, 4294967264  ;;  %v263_v0 = vld [vmem:[%s219_s9] sm:$0xff]  ;;  %vm273_vm0 = vcmask 1043456   ;;  %v265_v22 = vlaneseq  ;;  %v264_v23 = vld [vmem:[%s229_s11] sm:$0x3]  ;;  %vm355_vm4 = vcmask 1040384   ;;  %s411_s19 = scalar_lea.hbm %s1025_s2, %s830_s15  ;;  %s425_s5 = scalar_lea.hbm %s1026_s3, %s830_s15 }
  0x29   : > { %268 = vst [vmem:[#allocation1] ss:$2 sm:$0xff] %v263_v0  ;;  %v322_v31 = vperm.slane %v264_v23, 0  ;;  %v323_v32 = vperm.slane %v264_v23, 1  ;;  %vm347_vm3 = vcmp.ne.s32.totalorder %v264_v23, 4294967196  ;;  %s254_s21 = scalar_lea.vmem [#allocation7], %s947_s6 }
  0x2a   : > { %v266_v26 = vshrl.u32 %v265_v22, 7  ;;  %s413_s23 = sshll.u32 %s254_s21, 4  ;;  %s415_s29 = sshll.u32 %s411_s19, 4  ;;  %s414_s23 = int_to_ptr.vmem [resolvable:$true] %s413_s23  ;;  %s416_s29 = int_to_ptr.hbm [resolvable:$true] %s415_s29 }
  0x2b   : > { %s398_s7 = scalar_lea.sflag [#allocation4], %s947_s6  ;;  %s734_s8 = sshra.s32 %s416_s29, 4  ;;  %s735_s8 = int_to_ptr.hbm [resolvable:$true] %s734_s8 }
  0x2c   : > { %vm324_vm1 = vcmp.eq.s32.totalorder %v266_v26, %v322_v31  ;;  %vm325_vm2 = vcmp.eq.s32.totalorder %v266_v26, %v323_v32  ;;  %s736_s9 = scalar_lea.hbm %s735_s8, 1  ;;  %s740_s11 = scalar_lea.hbm %s1025_s2, 2 }
  0x2d   : > { %p737_p4 = scmp.ne.s32.totalorder %s735_s8, %s736_s9  ;;  %p741_p7 = scmp.lt.s32.totalorder %s735_s8, %s1025_s2 }
  0x2e   : > { %p742_p8 = scmp.lt.s32.totalorder %s740_s11, %s736_s9 }
  0x2f   : > { %p738_p5 = pnand %p737_p4, %p912_p9 }
  0x30   : > { %v269_v1 = vld.sshfl [vmem:[#allocation1] sm:$0xff pattern:$0x75316420]  ;;  %v270_v2 = vld.sshfl [vmem:[#allocation1 + $0x8] sm:$0xff pattern:$0x75316420]  ;;  %p743_p10 = por %p742_p8, %p741_p7 }
  0x31   : > { %v274_v3 = vsel %vm273_vm0, %v269_v1, -inf  ;;  %v281_v4 = vsel %vm273_vm0, %v270_v2, -inf  ;;  %p739_p6 = pneg %p738_p5 }
  0x32   : > { %v275_v5 = vrot.slane %v274_v3, 4  ;;  %v282_v6 = vrot.slane %v281_v4, 4 }
  0x33   : > { %p744_p13 = pnand %p743_p10, %p739_p6 }
  0x34   : > { %v276_v7 = vmax.f32 %v274_v3, %v275_v5  ;;  %v283_v8 = vmax.f32 %v281_v4, %v282_v6  ;;  %v840_v5 = vmov 0.0  }
  0x35   : > { %v573_v6 = vsel %vm347_vm3, 1.0, %v840_v5 }
  0x36   : > { %v277_v9 = vrot.slane %v276_v7, 2  ;;  %v284_v10 = vrot.slane %v283_v8, 2 }
  0x38   : > { %v278_v11 = vmax.f32 %v276_v7, %v277_v9  ;;  %v285_v12 = vmax.f32 %v283_v8, %v284_v10 }
  0x3a   : > { %v279_v13 = vrot.slane %v278_v11, 1  ;;  %v286_v14 = vrot.slane %v285_v12, 1 }
  0x3c   : > { %v280_v15 = vmax.f32 %v278_v11, %v279_v13  ;;  %v287_v16 = vmax.f32 %v285_v12, %v286_v14  ;;  %v379_v14 = vperm.slane %v573_v6, 0 }
  0x3e   : > { %v290_v17 = vrot.slane %v287_v16, 4 }
  0x40   : > { %v291_v18 = vsel %vm273_vm0, %v280_v15, %v290_v17  ;;  %v380_v17 = vperm.slane %v573_v6, 1 }
  0x41   : > { %v293_v19 = vsub.f32 %v263_v0, %v291_v18 }
  0x43   : > { %v294_v20 = vmul.f32 1.442695, %v293_v19  ;;  %v383_v19 = vsel %vm355_vm4, %v379_v14, 0.0 }
  0x45   : > { %654 = vpow2.f32 %v294_v20 }
  0x4b   : > { %v655_v21 = vpop.eup %654 }
  0x4c   : > { %297 = vst [vmem:[#allocation1] ss:$2 sm:$0xff] %v655_v21 }
  0x53   : > { %v298_v24 = vld.sshfl [vmem:[#allocation1] sm:$0xff pattern:$0x75316420]  ;;  %v299_v25 = vld.sshfl [vmem:[#allocation1 + $0x8] sm:$0xff pattern:$0x75316420] }
  0x54   : > { %v302_v27 = vsel %vm273_vm0, %v298_v24, 0.0  ;;  %v309_v28 = vsel %vm273_vm0, %v299_v25, 0.0  ;;  %326 = vst [vmem:[#allocation1] ss:$2 sm:$0xff] %v263_v0 }
  0x55   : > { %v303_v29 = vrot.slane %v302_v27, 4  ;;  %v310_v30 = vrot.slane %v309_v28, 4 }
  0x57   : > { %v304_v33 = vadd.f32 %v303_v29, %v302_v27  ;;  %v311_v34 = vadd.f32 %v310_v30, %v309_v28 }
  0x59   : > { %v305_v35 = vrot.slane %v304_v33, 2  ;;  %v312_v36 = vrot.slane %v311_v34, 2 }
  0x5b   : > { %v306_v37 = vadd.f32 %v305_v35, %v304_v33  ;;  %v313_v38 = vadd.f32 %v312_v36, %v311_v34  ;;  %v327_v39 = vld.sshfl [vmem:[#allocation1] sm:$0xff pattern:$0x75316420]  ;;  %v328_v40 = vld.sshfl [vmem:[#allocation1 + $0x8] sm:$0xff pattern:$0x75316420] }
  0x5c   : > { %v331_v41 = vsel %vm324_vm1, %v327_v39, 0.0  ;;  %v332_v42 = vsel %vm325_vm2, %v328_v40, 0.0 }
  0x5d   : > { %v307_v43 = vrot.slane %v306_v37, 1  ;;  %v314_v44 = vrot.slane %v313_v38, 1  ;;  %v333_v45 = vsel %vm273_vm0, %v331_v41, 0.0  ;;  %v340_v46 = vsel %vm273_vm0, %v332_v42, 0.0 }
  0x5e   : > { %v334_v47 = vrot.slane %v333_v45, 4  ;;  %v341_v48 = vrot.slane %v340_v46, 4 }
  0x5f   : > { %v308_v49 = vadd.f32 %v307_v43, %v306_v37  ;;  %v315_v50 = vadd.f32 %v314_v44, %v313_v38 }
  0x60   : > { %v335_v51 = vadd.f32 %v334_v47, %v333_v45  ;;  %v342_v52 = vadd.f32 %v341_v48, %v340_v46 }
  0x61   : > { %656 = vlog2.f32 %v308_v49 }
  0x62   : > { %658 = vlog2.f32 %v315_v50  ;;  %v336_v53 = vrot.slane %v335_v51, 2  ;;  %v343_v54 = vrot.slane %v342_v52, 2 }
  0x64   : > { %v337_v55 = vadd.f32 %v336_v53, %v335_v51  ;;  %v344_v56 = vadd.f32 %v343_v54, %v342_v52 }
  0x66   : > { %v338_v57 = vrot.slane %v337_v55, 1  ;;  %v345_v58 = vrot.slane %v344_v56, 1 }
  0x67   : > { %v657_v59 = vpop.eup %656 }
  0x68   : > { %v659_v60 = vpop.eup %658  ;;  %v317_v61 = vmul.f32 0.6931472, %v657_v59  ;;  %v339_v63 = vadd.f32 %v338_v57, %v337_v55  ;;  %v346_v0 = vadd.f32 %v345_v58, %v344_v56 }
  0x69   : > { %v319_v62 = vmul.f32 0.6931472, %v659_v60 }
  0x6a   : > { %v320_v1 = vadd.f32 %v317_v61, %v280_v15  ;;  %v384_v15 = vsel %vm355_vm4, %v380_v17, 0.0 }
  0x6b   : > { %v321_v2 = vadd.f32 %v319_v62, %v287_v16  ;;  %v385_v16 = vadd.f32 %v384_v15, %v383_v19 }
  0x6c   : > { %v350_v3 = vsub.f32 %v320_v1, %v339_v63 }
  0x6d   : > { %v351_v4 = vsub.f32 %v321_v2, %v346_v0 }
  0x6f   : > { %v354_v7 = vrot.slane %v351_v4, 7 }
  0x71   : > { %v356_v8 = vsel %vm355_vm4, %v350_v3, %v354_v7 }
  0x72   : > { %v358_v9 = vmul.f32 %v573_v6, %v356_v8 }
  0x74   : > { %v360_v10 = vperm.slane %v358_v9, 0  ;;  %v361_v11 = vperm.slane %v358_v9, 1 }
  0x76   : > { %v364_v12 = vsel %vm355_vm4, %v360_v10, 0.0  ;;  %v365_v13 = vsel %vm355_vm4, %v361_v11, 0.0 }
  0x77   : > { %v366_v18 = vadd.f32 %v365_v13, %v364_v12 }
  0x79   : > { %367 = vadd.xlane.f32.xlu0 %v366_v18 }
  0x81   : > { %386 = vadd.xlane.f32.xlu0 %v385_v16 }
  0xec   : > { %v368_v20 = vpop.xlane.xlu0 %367 }
  0xed   : > { %v369_v21 = vrot.slane %v368_v20, 4 }
  0xef   : > { %v370_v22 = vadd.f32 %v369_v21, %v368_v20 }
  0xf1   : > { %v371_v23 = vrot.slane %v370_v22, 2 }
  0xf3   : > { %v372_v24 = vadd.f32 %v371_v23, %v370_v22 }
  0xf4   : > { %v387_v25 = vpop.xlane.xlu0 %386 }
  0xf5   : > { %v388_v26 = vrot.slane %v387_v25, 4  ;;  %v373_v27 = vrot.slane %v372_v24, 1 }
  0xf7   : > { %v389_v28 = vadd.f32 %v388_v26, %v387_v25  ;;  %v374_v29 = vadd.f32 %v373_v27, %v372_v24 }
  0xf9   : > { %v390_v30 = vrot.slane %v389_v28, 2  ;;  %577 = vpush %v374_v29 }
  0xfb   : > { %v391_v31 = vadd.f32 %v390_v30, %v389_v28 }
  0xfd   : > { %v392_v32 = vrot.slane %v391_v31, 1 }
  0xff   : > { %v393_v33 = vadd.f32 %v392_v32, %v391_v31 }
 0x101   : > { %579 = vpush %v393_v33 }
 0x12a   : > { %s578_s30 = spop %577 }
 0x12b   : > { %v376_v34 = vstv %s578_s30 }
 0x12c   : > { %377 = vst [vmem:[%s254_s21] sm:$0x1] %v376_v34 }
 0x12d   : > { %747 = shalt.err (!%p744_p13)
}
 0x12e   : > { %585 = dma.vmem_to_hbm [thread:$0]  (%p912_p9), %s414_s23, 16, %s416_s29, %s398_s7  }
 0x12f   : > { %s260_s15 = scalar_lea.vmem [#allocation8], %s947_s6  ;;  %s429_s21 = sshll.u32 %s425_s5, 4  ;;  %s430_s21 = int_to_ptr.hbm [resolvable:$true] %s429_s21 }
 0x130   : > { %s427_s19 = sshll.u32 %s260_s15, 4  ;;  %s402_s22 = scalar_lea.sflag [#allocation9], %s947_s6  ;;  %s428_s19 = int_to_ptr.vmem [resolvable:$true] %s427_s19 }
 0x131   : > { %s762_s4 = sshra.s32 %s430_s21, 4  ;;  %s768_s23 = scalar_lea.hbm %s1026_s3, 2  ;;  %s763_s4 = int_to_ptr.hbm [resolvable:$true] %s762_s4 }
 0x132   : > { %s580_s30 = spop %579  ;;  %s764_s8 = scalar_lea.hbm %s763_s4, 1 }
 0x133   : > { %v395_v35 = vstv %s580_s30  ;;  %p765_p0 = scmp.ne.s32.totalorder %s763_s4, %s764_s8  ;;  %p769_p3 = scmp.lt.s32.totalorder %s763_s4, %s1026_s3 }
 0x134   : > { %396 = vst [vmem:[%s260_s15] sm:$0x1] %v395_v35  ;;  %p770_p4 = scmp.lt.s32.totalorder %s768_s23, %s764_s8 }
 0x135   : > { %p766_p1 = pnand %p765_p0, %p912_p9 }
 0x136   : > { %p771_p5 = por %p770_p4, %p769_p3 }
 0x137   : > { %p767_p2 = pneg %p766_p1 }
 0x139   : > { %p772_p6 = pnand %p771_p5, %p767_p2 }
 0x13b   : > { %775 = shalt.err (!%p772_p6)
}
 0x13c   : > { %586 = dma.vmem_to_hbm [thread:$0]  (%p912_p9), %s428_s19, 16, %s430_s21, %s402_s22  }
 0x13d PF: > { %s441_s6 = sand.u32 1, %s818_s12   ;;  %p597_p7 = pnand %p564_p12, %p919_p11 }
 0x13e   : > { %s442_s5 = scalar_lea.sflag [#allocation4], %s441_s6 }
 0x13f   : > { %p598_p8 = pneg %p597_p7 }
 0x141   : > { %809 = dma.done.wait (%p598_p8), %s442_s5, 16  }
 0x142   : > { %811 = vsyncadd (%p598_p8), %s442_s5, 4294967280  ;;  %s451_s10 = scalar_lea.sflag [#allocation9], %s441_s6 }
 0x143   : > { %813 = dma.done.wait (%p598_p8), %s451_s10, 16  }
 0x144   : > { %815 = vsyncadd (%p598_p8), %s451_s10, 4294967280  ;;  %s26_s17 = sadd.s32 1, %s838_s17   ;;  %s1032_s12 = smov %s822_s13 }
 0x145   : > { %p23_p10 = scmp.ge.s32.totalorder %s26_s17, 4   ;;  %s1033_s13 = smov %s826_s14 }
 0x146   : > { %s1034_s14 = smov %s917_s26  ;;  %s1035_s15 = smov %s834_s16 }
 0x147   : > { %s1036_s16 = smov %s1038_s20  ;;  %25 = sbr.rel (!%p23_p10) target bundleno = 10 (0xa), region = 103 }
 0x14c   :  { %456 = vsyncpa [#allocation3], 1 }
 0x14d   :  { %458 = vsyncpa [#allocation3 + $0x1], 1 }
 0x14e   :  { %459 = vsyncpa [#allocation6], 1 }
 0x14f   :  { %461 = vsyncpa [#allocation6 + $0x1], 1 }
 0x150   :  { %462 = vsyncpa [#allocation4], 1 }
 0x151   :  { %464 = vsyncpa [#allocation4 + $0x1], 1 }
 0x152   :  { %465 = vsyncpa [#allocation9], 1 }
 0x153   :  { %467 = vsyncpa [#allocation9 + $0x1], 1 }

</bundles_post_ra>
